<compile_context>
chip_gen: v7x
topology: tpu7x:2x2x1
jax: 0.10.0
libtpu: 0.0.40
codegen_flags: <defaults>
</compile_context>

<pallas_src>
import math
from functools import partial

import jax
import jax.numpy as jnp
from jax.experimental import pallas as pl
from jax.experimental.pallas import tpu as pltpu


# ----------------------------------------------------------------------------- #
# Fused Pallas kernel: (qkv + rot) proj + RoPE FMA + batched GQA attention + o_proj
# ----------------------------------------------------------------------------- #
def _fused_attention_kernel(
    x_ref, wbig_ref, wo_ref, cos_ref, sin_ref, mask_ref, o_ref, *, B, S, F, H, KVH, D
):
    BS = B * S
    QW = H * D
    KW = KVH * D
    # y = x @ W.T  ==  dot_general contracting x's last dim with W's last dim
    dn_xwT = (((1,), (1,)), ((), ()))

    x = x_ref[...]                                               # (B*S, F)

    # --- one MXU push: [q(scaled) | k | v | rotate_half(q)(scaled) | rotate_half(k)] ---
    proj = jax.lax.dot_general(
        x, wbig_ref[...], dn_xwT, preferred_element_type=jnp.float32
    )                                                            # (B*S, 2*QW + 3*KW)

    qk = proj[:, : QW + KW]                                      # (B*S, QW+KW)
    v = proj[:, QW + KW : QW + 2 * KW]                           # (B*S, KW)
    qk_rot = proj[:, QW + 2 * KW :]                              # (B*S, QW+KW)

    # --- RoPE: single elementwise FMA (rotate-half & 1/sqrt(D) folded at trace time) ---
    qk = qk * cos_ref[...] + qk_rot * sin_ref[...]

    q_roped = qk[:, :QW]                                         # (B*S, H*D)
    k_roped = qk[:, QW:]                                         # (B*S, KVH*D)

    # --- stack heads along sublanes: rows ordered (head, batch, seq) ---
    q_st = jnp.concatenate(
        [q_roped[:, h * D : (h + 1) * D] for h in range(H)], axis=0
    )                                                            # (H*B*S, D)
    k_st = jnp.concatenate(
        [k_roped[:, g * D : (g + 1) * D] for g in range(KVH)], axis=0
    )                                                            # (KVH*B*S, D)
    v_st = jnp.concatenate(
        [v[:, g * D : (g + 1) * D] for g in range(KVH)], axis=0
    )                                                            # (KVH*B*S, D)

    # --- one scores matmul for all (batch, head) pairs + block-diagonal mask ---
    scores = jax.lax.dot_general(
        q_st, k_st, dn_xwT, preferred_element_type=jnp.float32
    )                                                            # (H*B*S, KVH*B*S)
    scores = scores + mask_ref[...]

    # --- one softmax (single max/exp/sum/recip stream) ---
    scores = scores - jnp.max(scores, axis=-1, keepdims=True)
    p = jnp.exp(scores)
    p = p * pl.reciprocal(jnp.sum(p, axis=-1, keepdims=True), approx=False)

    # --- one P@V matmul ---
    attn = jnp.dot(p, v_st, preferred_element_type=jnp.float32)  # (H*B*S, D)

    # --- output projection by accumulation over heads (no lane-axis concat) ---
    wo = wo_ref[...]                                             # (F, H*D)
    y = jax.lax.dot_general(
        attn[0:BS, :], wo[:, 0:D], dn_xwT, preferred_element_type=jnp.float32
    )
    for h in range(1, H):
        y = y + jax.lax.dot_general(
            attn[h * BS : (h + 1) * BS, :],
            wo[:, h * D : (h + 1) * D],
            dn_xwT,
            preferred_element_type=jnp.float32,
        )                                                        # (B*S, F)

    # single merged, lane-dense store of the whole result
    o_ref[...] = y.astype(o_ref.dtype)


def full_attention_forward(hidden_states, w_qkv, w_o, config):
    """hidden_states: (B, S, F); w_qkv: (op_size, F); w_o: (F, H*D) -> (B, S, F)."""
    B, S, F = hidden_states.shape
    H = config["num_attention_heads"]
    KVH = config["num_key_value_heads"]
    D = config["head_dim"] if config["head_dim"] is not None else F // H
    G = H // KVH
    base = config["pos_emb_base"]
    half = D // 2
    scale = 1.0 / math.sqrt(D)
    QW, KW = H * D, KVH * D

    # ---- trace-time weight prep: fold 1/sqrt(D) into q rows; build rotate-half weights ----
    w_q = w_qkv[:QW] * scale
    w_k = w_qkv[QW : QW + KW]
    w_v = w_qkv[QW + KW :]

    def rot_rows(w_head):  # (D, F): rotate_half applied to the projection's output dim
        return jnp.concatenate([-w_head[half:], w_head[:half]], axis=0)

    w_q_rot = jnp.concatenate([rot_rows(w_q[h * D : (h + 1) * D]) for h in range(H)], axis=0)
    w_k_rot = jnp.concatenate([rot_rows(w_k[g * D : (g + 1) * D]) for g in range(KVH)], axis=0)
    w_big = jnp.concatenate([w_q, w_k, w_v, w_q_rot, w_k_rot], axis=0)  # (2*QW+3*KW, F)

    # ---- rotary tables (matches RotaryEncoder), lane-tiled per head, sublane-tiled per batch ----
    pos = jnp.arange(S, dtype=jnp.float32)
    div = base ** (jnp.arange(0, D, 2, dtype=jnp.float32) / D)
    div = jnp.concatenate([div, div])                              # (D,)
    freqs = pos[:, None] / div[None, :]                            # (S, D)
    cos_qk = jnp.tile(jnp.tile(jnp.cos(freqs), (1, H + KVH)), (B, 1))   # (B*S, (H+KVH)*D)
    sin_qk = jnp.tile(jnp.tile(jnp.sin(freqs), (1, H + KVH)), (B, 1))

    # ---- block-diagonal (batch, kv-group) additive mask for the stacked-head scores ----
    row = jnp.arange(H * B * S)
    col = jnp.arange(KVH * B * S)
    row_g = (row // (B * S)) // G
    row_b = (row % (B * S)) // S
    col_g = col // (B * S)
    col_b = (col % (B * S)) // S
    valid = (row_g[:, None] == col_g[None, :]) & (row_b[:, None] == col_b[None, :])
    mask = jnp.where(valid, 0.0, -1e30).astype(jnp.float32)        # (H*B*S, KVH*B*S)

    x2d = hidden_states.reshape(B * S, F)  # contiguous reshape: free bitcast in XLA

    kernel = partial(_fused_attention_kernel, B=B, S=S, F=F, H=H, KVH=KVH, D=D)
    big_rows = w_big.shape[0]

    out2d = pl.pallas_call(
        kernel,
        out_shape=jax.ShapeDtypeStruct((B * S, F), hidden_states.dtype),
        grid=(1,),
        in_specs=[
            pl.BlockSpec((B * S, F), lambda i: (0, 0)),
            pl.BlockSpec((big_rows, F), lambda i: (0, 0)),
            pl.BlockSpec((F, QW), lambda i: (0, 0)),
            pl.BlockSpec((B * S, (H + KVH) * D), lambda i: (0, 0)),
            pl.BlockSpec((B * S, (H + KVH) * D), lambda i: (0, 0)),
            pl.BlockSpec((H * B * S, KVH * B * S), lambda i: (0, 0)),
        ],
        out_specs=pl.BlockSpec((B * S, F), lambda i: (0, 0)),
        compiler_params=pltpu.CompilerParams(dimension_semantics=("arbitrary",)),
    )(x2d, w_big, w_o, cos_qk, sin_qk, mask)

    return out2d.reshape(B, S, F)


# ----------------------------------------------------------------------------- #
# Pure-JAX reference for the correctness check
# ----------------------------------------------------------------------------- #
def reference_forward(hidden_states, w_qkv, w_o, config):
    B, S, F = hidden_states.shape
    H = config["num_attention_heads"]
    KVH = config["num_key_value_heads"]
    D = config["head_dim"] if config["head_dim"] is not None else F // H
    G = H // KVH
    base = config["pos_emb_base"]

    qkv = hidden_states @ w_qkv.T
    q_pos = H * D
    q = qkv[..., :q_pos].reshape(B, S, H, D).transpose(0, 2, 1, 3)
    k = qkv[..., q_pos : q_pos + KVH * D].reshape(B, S, KVH, D).transpose(0, 2, 1, 3)
    v = qkv[..., q_pos + KVH * D :].reshape(B, S, KVH, D).transpose(0, 2, 1, 3)

    pos = jnp.arange(S, dtype=jnp.float32)
    div = base ** (jnp.arange(0, D, 2, dtype=jnp.float32) / D)
    div = jnp.concatenate([div, div])
    freqs = pos[:, None] / div[None, :]

    def rope(x):
        x1 = x[..., : D // 2]
        x2 = x[..., D // 2 :]
        rot = jnp.concatenate([-x2, x1], axis=-1)
        return x * jnp.cos(freqs) + rot * jnp.sin(freqs)

    q = rope(q)
    k = rope(k)
    k = jnp.repeat(k, G, axis=1)
    v = jnp.repeat(v, G, axis=1)

    scores = jnp.einsum("bhqd,bhkd->bhqk", q, k) / math.sqrt(D)
    p = jax.nn.softmax(scores, axis=-1)
    attn = jnp.einsum("bhqk,bhkd->bhqd", p, v)
    attn = attn.transpose(0, 2, 1, 3).reshape(B, S, H * D)
    return attn @ w_o.T


# ----------------------------------------------------------------------------- #
if __name__ == "__main__":
    config = {
        "feature_space_dim": 32,
        "num_attention_heads": 4,
        "num_key_value_heads": 2,
        "head_dim": None,
        "attention_dropout": 0.0,
        "pos_emb": "rotary",
        "pos_emb_base": 100000.0,
    }
    B, S, F = 2, 8, config["feature_space_dim"]
    H = config["num_attention_heads"]
    KVH = config["num_key_value_heads"]
    D = F // H
    op_size = H * D + 2 * (KVH * D)

    key = jax.random.PRNGKey(0)
    k1, k2, k3 = jax.random.split(key, 3)
    hidden_states = jax.random.normal(k1, (B, S, F), dtype=jnp.float32)
    # deterministic synthetic weights (nn.Linear layout: (out_features, in_features))
    w_qkv = jax.random.normal(k2, (op_size, F), dtype=jnp.float32) * (1.0 / math.sqrt(F))
    w_o = jax.random.normal(k3, (F, H * D), dtype=jnp.float32) * (1.0 / math.sqrt(H * D))

    out = full_attention_forward(hidden_states, w_qkv, w_o, config)
    out = jax.block_until_ready(out)

    ref = reference_forward(hidden_states, w_qkv, w_o, config)
    if not jnp.allclose(out, ref, atol=1e-4, rtol=1e-4):
        raise AssertionError(
            f"Pallas output mismatch vs reference: max abs err "
            f"{float(jnp.max(jnp.abs(out - ref)))}"
        )
    print("KERNEL_OK")
</pallas_src>

<mosaic_0001>
module attributes {stable_mosaic.version = 11 : i64} {
  func.func @_fused_attention_kernel(%arg0: i32, %arg1: memref<16x32xf32, #tpu.memory_space<vmem>>, %arg2: memref<112x32xf32, #tpu.memory_space<vmem>>, %arg3: memref<32x32xf32, #tpu.memory_space<vmem>>, %arg4: memref<16x48xf32, #tpu.memory_space<vmem>>, %arg5: memref<16x48xf32, #tpu.memory_space<vmem>>, %arg6: memref<64x32xf32, #tpu.memory_space<vmem>>, %arg7: memref<16x32xf32, #tpu.memory_space<vmem>>) attributes {dimension_semantics = [#tpu.dimension_semantics<arbitrary>], iteration_bounds = array<i64: 1>, scalar_prefetch = 0 : i64, scratch_operands = 0 : i64, tpu.core_type = #tpu.core_type<tc>, window_params = [{pipeline_mode = #tpu.pipeline_mode<synchronous>, transform_indices = @transform_0, window_bounds = array<i64: 16, 32>}, {pipeline_mode = #tpu.pipeline_mode<synchronous>, transform_indices = @transform_1, window_bounds = array<i64: 112, 32>}, {pipeline_mode = #tpu.pipeline_mode<synchronous>, transform_indices = @transform_2, window_bounds = array<i64: 32, 32>}, {pipeline_mode = #tpu.pipeline_mode<synchronous>, transform_indices = @transform_3, window_bounds = array<i64: 16, 48>}, {pipeline_mode = #tpu.pipeline_mode<synchronous>, transform_indices = @transform_4, window_bounds = array<i64: 16, 48>}, {pipeline_mode = #tpu.pipeline_mode<synchronous>, transform_indices = @transform_5, window_bounds = array<i64: 64, 32>}, {pipeline_mode = #tpu.pipeline_mode<synchronous>, transform_indices = @transform_6, window_bounds = array<i64: 16, 32>}]} {
    %c0 = arith.constant 0 : index
    %c0_0 = arith.constant 0 : index
    %0 = vector.load %arg1[%c0, %c0_0] : memref<16x32xf32, #tpu.memory_space<vmem>>, vector<16x32xf32>
    %c0_1 = arith.constant 0 : index
    %c0_2 = arith.constant 0 : index
    %1 = vector.load %arg2[%c0_1, %c0_2] : memref<112x32xf32, #tpu.memory_space<vmem>>, vector<112x32xf32>
    %cst = arith.constant dense<0.000000e+00> : vector<16x112xf32>
    %2 = tpu.matmul %0, %1, %cst {dimension_numbers = #tpu.dot_dimension_numbers<[1], [1], [0], [0], [0, 0, 1, 0], [], []>} : vector<16x32xf32>, vector<112x32xf32>, vector<16x112xf32> -> vector<16x112xf32>
    %3 = vector.extract_strided_slice %2 {offsets = [0, 0], sizes = [16, 48], strides = [1, 1]} : vector<16x112xf32> to vector<16x48xf32>
    %4 = vector.extract_strided_slice %2 {offsets = [0, 48], sizes = [16, 16], strides = [1, 1]} : vector<16x112xf32> to vector<16x16xf32>
    %5 = vector.extract_strided_slice %2 {offsets = [0, 64], sizes = [16, 48], strides = [1, 1]} : vector<16x112xf32> to vector<16x48xf32>
    %c0_3 = arith.constant 0 : index
    %c0_4 = arith.constant 0 : index
    %6 = vector.load %arg4[%c0_3, %c0_4] : memref<16x48xf32, #tpu.memory_space<vmem>>, vector<16x48xf32>
    %7 = arith.mulf %3, %6 : vector<16x48xf32>
    %c0_5 = arith.constant 0 : index
    %c0_6 = arith.constant 0 : index
    %8 = vector.load %arg5[%c0_5, %c0_6] : memref<16x48xf32, #tpu.memory_space<vmem>>, vector<16x48xf32>
    %9 = arith.mulf %5, %8 : vector<16x48xf32>
    %10 = arith.addf %7, %9 : vector<16x48xf32>
    %11 = vector.extract_strided_slice %10 {offsets = [0, 0], sizes = [16, 32], strides = [1, 1]} : vector<16x48xf32> to vector<16x32xf32>
    %12 = vector.extract_strided_slice %10 {offsets = [0, 32], sizes = [16, 16], strides = [1, 1]} : vector<16x48xf32> to vector<16x16xf32>
    %13 = vector.extract_strided_slice %11 {offsets = [0, 0], sizes = [16, 8], strides = [1, 1]} : vector<16x32xf32> to vector<16x8xf32>
    %14 = vector.extract_strided_slice %11 {offsets = [0, 8], sizes = [16, 8], strides = [1, 1]} : vector<16x32xf32> to vector<16x8xf32>
    %15 = vector.extract_strided_slice %11 {offsets = [0, 16], sizes = [16, 8], strides = [1, 1]} : vector<16x32xf32> to vector<16x8xf32>
    %16 = vector.extract_strided_slice %11 {offsets = [0, 24], sizes = [16, 8], strides = [1, 1]} : vector<16x32xf32> to vector<16x8xf32>
    %17 = tpu.concatenate %13, %14, %15, %16 in 0 : vector<16x8xf32>, vector<16x8xf32>, vector<16x8xf32>, vector<16x8xf32> -> vector<64x8xf32>
    %18 = vector.extract_strided_slice %12 {offsets = [0, 0], sizes = [16, 8], strides = [1, 1]} : vector<16x16xf32> to vector<16x8xf32>
    %19 = vector.extract_strided_slice %12 {offsets = [0, 8], sizes = [16, 8], strides = [1, 1]} : vector<16x16xf32> to vector<16x8xf32>
    %20 = tpu.concatenate %18, %19 in 0 : vector<16x8xf32>, vector<16x8xf32> -> vector<32x8xf32>
    %21 = vector.extract_strided_slice %4 {offsets = [0, 0], sizes = [16, 8], strides = [1, 1]} : vector<16x16xf32> to vector<16x8xf32>
    %22 = vector.extract_strided_slice %4 {offsets = [0, 8], sizes = [16, 8], strides = [1, 1]} : vector<16x16xf32> to vector<16x8xf32>
    %23 = tpu.concatenate %21, %22 in 0 : vector<16x8xf32>, vector<16x8xf32> -> vector<32x8xf32>
    %cst_7 = arith.constant dense<0.000000e+00> : vector<64x32xf32>
    %24 = tpu.matmul %17, %20, %cst_7 {dimension_numbers = #tpu.dot_dimension_numbers<[1], [1], [0], [0], [0, 0, 1, 0], [], []>} : vector<64x8xf32>, vector<32x8xf32>, vector<64x32xf32> -> vector<64x32xf32>
    %c0_8 = arith.constant 0 : index
    %c0_9 = arith.constant 0 : index
    %25 = vector.load %arg6[%c0_8, %c0_9] : memref<64x32xf32, #tpu.memory_space<vmem>>, vector<64x32xf32>
    %26 = arith.addf %24, %25 : vector<64x32xf32>
    %cst_10 = arith.constant dense<0xFF800000> : vector<64xf32>
    %27 = vector.multi_reduction <maximumf>, %26, %cst_10 [1] : vector<64x32xf32> to vector<64xf32>
    %28 = vector.shape_cast %27 : vector<64xf32> to vector<64x1xf32>
    %29 = vector.broadcast %28 : vector<64x1xf32> to vector<64x32xf32>
    %30 = arith.subf %26, %29 : vector<64x32xf32>
    %31 = math.exp %30 : vector<64x32xf32>
    %cst_11 = arith.constant dense<0.000000e+00> : vector<64xf32>
    %32 = vector.multi_reduction <add>, %31, %cst_11 [1] : vector<64x32xf32> to vector<64xf32>
    %33 = vector.shape_cast %32 : vector<64xf32> to vector<64x1xf32>
    %34 = tpu.reciprocal %33 : vector<64x1xf32> -> vector<64x1xf32>
    %35 = vector.broadcast %34 : vector<64x1xf32> to vector<64x32xf32>
    %36 = arith.mulf %31, %35 : vector<64x32xf32>
    %cst_12 = arith.constant dense<0.000000e+00> : vector<64x8xf32>
    %37 = tpu.matmul %36, %23, %cst_12 {dimension_numbers = #tpu.dot_dimension_numbers<[1], [0], [0], [1], [0, 0, 1, 1], [], []>} : vector<64x32xf32>, vector<32x8xf32>, vector<64x8xf32> -> vector<64x8xf32>
    %c0_13 = arith.constant 0 : index
    %c0_14 = arith.constant 0 : index
    %38 = vector.load %arg3[%c0_13, %c0_14] : memref<32x32xf32, #tpu.memory_space<vmem>>, vector<32x32xf32>
    %39 = vector.extract_strided_slice %37 {offsets = [0, 0], sizes = [16, 8], strides = [1, 1]} : vector<64x8xf32> to vector<16x8xf32>
    %40 = vector.extract_strided_slice %38 {offsets = [0, 0], sizes = [32, 8], strides = [1, 1]} : vector<32x32xf32> to vector<32x8xf32>
    %cst_15 = arith.constant dense<0.000000e+00> : vector<16x32xf32>
    %41 = tpu.matmul %39, %40, %cst_15 {dimension_numbers = #tpu.dot_dimension_numbers<[1], [1], [0], [0], [0, 0, 1, 0], [], []>} : vector<16x8xf32>, vector<32x8xf32>, vector<16x32xf32> -> vector<16x32xf32>
    %42 = vector.extract_strided_slice %37 {offsets = [16, 0], sizes = [16, 8], strides = [1, 1]} : vector<64x8xf32> to vector<16x8xf32>
    %43 = vector.extract_strided_slice %38 {offsets = [0, 8], sizes = [32, 8], strides = [1, 1]} : vector<32x32xf32> to vector<32x8xf32>
    %cst_16 = arith.constant dense<0.000000e+00> : vector<16x32xf32>
    %44 = tpu.matmul %42, %43, %cst_16 {dimension_numbers = #tpu.dot_dimension_numbers<[1], [1], [0], [0], [0, 0, 1, 0], [], []>} : vector<16x8xf32>, vector<32x8xf32>, vector<16x32xf32> -> vector<16x32xf32>
    %45 = arith.addf %41, %44 : vector<16x32xf32>
    %46 = vector.extract_strided_slice %37 {offsets = [32, 0], sizes = [16, 8], strides = [1, 1]} : vector<64x8xf32> to vector<16x8xf32>
    %47 = vector.extract_strided_slice %38 {offsets = [0, 16], sizes = [32, 8], strides = [1, 1]} : vector<32x32xf32> to vector<32x8xf32>
    %cst_17 = arith.constant dense<0.000000e+00> : vector<16x32xf32>
    %48 = tpu.matmul %46, %47, %cst_17 {dimension_numbers = #tpu.dot_dimension_numbers<[1], [1], [0], [0], [0, 0, 1, 0], [], []>} : vector<16x8xf32>, vector<32x8xf32>, vector<16x32xf32> -> vector<16x32xf32>
    %49 = arith.addf %45, %48 : vector<16x32xf32>
    %50 = vector.extract_strided_slice %37 {offsets = [48, 0], sizes = [16, 8], strides = [1, 1]} : vector<64x8xf32> to vector<16x8xf32>
    %51 = vector.extract_strided_slice %38 {offsets = [0, 24], sizes = [32, 8], strides = [1, 1]} : vector<32x32xf32> to vector<32x8xf32>
    %cst_18 = arith.constant dense<0.000000e+00> : vector<16x32xf32>
    %52 = tpu.matmul %50, %51, %cst_18 {dimension_numbers = #tpu.dot_dimension_numbers<[1], [1], [0], [0], [0, 0, 1, 0], [], []>} : vector<16x8xf32>, vector<32x8xf32>, vector<16x32xf32> -> vector<16x32xf32>
    %53 = arith.addf %49, %52 : vector<16x32xf32>
    %c0_19 = arith.constant 0 : index
    %c0_20 = arith.constant 0 : index
    %54 = vector.load %arg7[%c0_19, %c0_20] : memref<16x32xf32, #tpu.memory_space<vmem>>, vector<16x32xf32>
    tpu.vector_store %arg7[%c0_19, %c0_20], %53 {strides = array<i32>} : memref<16x32xf32, #tpu.memory_space<vmem>>, vector<16x32xf32>,
    return
  }
  func.func @transform_0(%arg0: i32) -> (i32, i32) {
    %c0_i32 = arith.constant 0 : i32
    %c0_i32_0 = arith.constant 0 : i32
    %c0_i32_1 = arith.constant 0 : i32
    return %c0_i32, %c0_i32_0 : i32, i32
  }
  func.func @transform_1(%arg0: i32) -> (i32, i32) {
    %c0_i32 = arith.constant 0 : i32
    %c0_i32_0 = arith.constant 0 : i32
    %c0_i32_1 = arith.constant 0 : i32
    return %c0_i32, %c0_i32_0 : i32, i32
  }
  func.func @transform_2(%arg0: i32) -> (i32, i32) {
    %c0_i32 = arith.constant 0 : i32
    %c0_i32_0 = arith.constant 0 : i32
    %c0_i32_1 = arith.constant 0 : i32
    return %c0_i32, %c0_i32_0 : i32, i32
  }
  func.func @transform_3(%arg0: i32) -> (i32, i32) {
    %c0_i32 = arith.constant 0 : i32
    %c0_i32_0 = arith.constant 0 : i32
    %c0_i32_1 = arith.constant 0 : i32
    return %c0_i32, %c0_i32_0 : i32, i32
  }
  func.func @transform_4(%arg0: i32) -> (i32, i32) {
    %c0_i32 = arith.constant 0 : i32
    %c0_i32_0 = arith.constant 0 : i32
    %c0_i32_1 = arith.constant 0 : i32
    return %c0_i32, %c0_i32_0 : i32, i32
  }
  func.func @transform_5(%arg0: i32) -> (i32, i32) {
    %c0_i32 = arith.constant 0 : i32
    %c0_i32_0 = arith.constant 0 : i32
    %c0_i32_1 = arith.constant 0 : i32
    return %c0_i32, %c0_i32_0 : i32, i32
  }
  func.func @transform_6(%arg0: i32) -> (i32, i32) {
    %c0_i32 = arith.constant 0 : i32
    %c0_i32_0 = arith.constant 0 : i32
    %c0_i32_1 = arith.constant 0 : i32
    return %c0_i32, %c0_i32_0 : i32, i32
  }
}

</mosaic_0001>

<bundles_post_ra>
// kernel: tpu_custom_call.1
= control target key start
LH: loop header
LB: loop body
LE: loop exit
PB: predicated region body
PF: predicated region fallthrough
CT: control target
= control target key end

     0   :  { %vm40_vm0 = vcmask 261120   ;;  %s1470_s13 = smov 64   ;;  %s1811_s0 = inlined_call_operand.vmem [shape: f32[16,32], index: 0, kind: input, shape index: {}]   ;;  %s1812_s1 = inlined_call_operand.vmem [shape: f32[112,32], index: 1, kind: input, shape index: {}]   ;;  %s1813_s2 = inlined_call_operand.vmem [shape: f32[32,32], index: 2, kind: input, shape index: {}]   ;;  %s1814_s3 = inlined_call_operand.vmem [shape: f32[16,48], index: 3, kind: input, shape index: {}]   ;;  %s1815_s4 = inlined_call_operand.vmem [shape: f32[16,48], index: 4, kind: input, shape index: {}]   ;;  %s1816_s5 = inlined_call_operand.vmem [shape: f32[64,32], index: 5, kind: input, shape index: {}]   ;;  %s1817_s6 = inlined_call_operand.hbm [shape: f32[16,32], index: 6, kind: output, shape index: {}]  }
   0x1   :  { %v26_v0 = vld [vmem:[%s1812_s1] sm:$0xff]  ;;  %v27_v1 = vld [vmem:[%s1812_s1 + $0x8] sm:$0xff]  ;;  %v28_v2 = vld [vmem:[%s1812_s1 + $0x10] sm:$0xff] }
   0x2   :  { %v1234_v3 = vpack.c.bf16 %v27_v1, %v26_v0  ;;  %vm1525_vm1 = vmpackc.low %vm40_vm0, %vm40_vm0  ;;  %v29_v5 = vld [vmem:[%s1812_s1 + $0x18] sm:$0xff]  ;;  %v24_v7 = vld [vmem:[%s1811_s0] sm:$0xff] }
   0x3   :  { %v1240_v6 = vpack.c.bf16 %v29_v5, %v28_v2  ;;  %v168_v8 = vld [vmem:[%s1815_s4] sm:$0xff]  ;;  %v31_v10 = vld [vmem:[%s1812_s1 + $0x28] sm:$0xff]  ;;  %1147 = vmatprep.mubr.msk.f32.mxu0 %vm40_vm0, %v24_v7 }
   0x4   :  { %1236 = vmatprep.subr.msk.bf16.mxu0 %vm1525_vm1, %v1234_v3  ;;  %v30_v9 = vld [vmem:[%s1812_s1 + $0x20] sm:$0xff]  ;;  %172 = vrot.lane.b32.xlu0 %v168_v8, %s1470_s13 }
   0x5   :  { %1239 = vmatpush3.bf16.xpose.msk.msra.mxu0 %vm1525_vm1, %v1234_v3 }
   0x6   :  { %1242 = vmatprep.subr.msk.bf16.mxu0 %vm1525_vm1, %v1240_v6 }
   0x7   :  { %11 = vsyncpa [#allocation3], 0  ;;  %v169_v11 = vld [vmem:[%s1815_s4 + $0x8] sm:$0xff]  ;;  %v1246_v12 = vpack.c.bf16 %v31_v10, %v30_v9  ;;  %v32_v13 = vld [vmem:[%s1812_s1 + $0x30] sm:$0xff]  ;;  %vm226_vm2 = vcmask 64512   ;;  %s1471_s11 = smov 120  }
   0x8   :  { %174 = vrot.lane.b32.xlu0 %v169_v11, %s1470_s13  ;;  %v33_v14 = vld [vmem:[%s1812_s1 + $0x38] sm:$0xff]  ;;  %v34_v16 = vld [vmem:[%s1812_s1 + $0x40] sm:$0xff]  ;;  %v35_v17 = vld [vmem:[%s1812_s1 + $0x48] sm:$0xff]  ;;  %s1472_s12 = smov 96   ;;  %s1474_s14 = smov 104  }
   0x9   :  { %v1252_v15 = vpack.c.bf16 %v33_v14, %v32_v13  ;;  %v1258_v18 = vpack.c.bf16 %v35_v17, %v34_v16  ;;  %v36_v19 = vld [vmem:[%s1812_s1 + $0x50] sm:$0xff]  ;;  %v37_v20 = vld [vmem:[%s1812_s1 + $0x58] sm:$0xff]  ;;  %v38_v22 = vld [vmem:[%s1812_s1 + $0x60] sm:$0xff] }
   0xa   :  { %v1264_v21 = vpack.c.bf16 %v37_v20, %v36_v19  ;;  %v39_v23 = vld [vmem:[%s1812_s1 + $0x68] sm:$0xff]  ;;  %v164_v33 = vld [vmem:[%s1814_s3] sm:$0xff]  ;;  %vm1623_vm3 = vmpackc.low %vm226_vm2, %vm226_vm2 }
   0xb   :  { %v1270_v24 = vpack.c.bf16 %v39_v23, %v38_v22  ;;  %v25_v25 = vld [vmem:[%s1811_s0 + $0x8] sm:$0xff]  ;;  %v210_v59 = vld [vmem:[%s1816_s5] sm:$0xff]  ;;  %v212_v1 = vld [vmem:[%s1816_s5 + $0x10] sm:$0xff] }
   0xc   :  { %v165_v36 = vld [vmem:[%s1814_s3 + $0x8] sm:$0xff]  ;;  %v213_v4 = vld [vmem:[%s1816_s5 + $0x18] sm:$0xff]  ;;  %v214_v7 = vld [vmem:[%s1816_s5 + $0x20] sm:$0xff] }
   0xd   :  { %1245 = vmatpush3.bf16.xpose.msk.msra.mxu0 %vm1525_vm1, %v1240_v6  ;;  %v211_v58 = vld [vmem:[%s1816_s5 + $0x8] sm:$0xff]  ;;  %v216_v14 = vld [vmem:[%s1816_s5 + $0x30] sm:$0xff]  ;;  %v217_v19 = vld [vmem:[%s1816_s5 + $0x38] sm:$0xff] }
   0xe   :  { %1248 = vmatprep.subr.msk.bf16.mxu0 %vm1525_vm1, %v1246_v12  ;;  %v215_v11 = vld [vmem:[%s1816_s5 + $0x28] sm:$0xff]  ;;  %s1475_s5 = smov 80  }
  0x15   :  { %1251 = vmatpush3.bf16.xpose.msk.msra.mxu0 %vm1525_vm1, %v1246_v12 }
  0x16   :  { %1254 = vmatprep.subr.msk.bf16.mxu0 %vm1525_vm1, %v1252_v15 }
  0x1d   :  { %1257 = vmatpush3.bf16.xpose.msk.msra.mxu0 %vm1525_vm1, %v1252_v15 }
  0x1e   :  { %1260 = vmatprep.subr.msk.bf16.mxu0 %vm1525_vm1, %v1258_v18 }
  0x25   :  { %1263 = vmatpush3.bf16.xpose.msk.msra.mxu0 %vm1525_vm1, %v1258_v18 }
  0x26   :  { %1266 = vmatprep.subr.msk.bf16.mxu0 %vm1525_vm1, %v1264_v21 }
  0x2d   :  { %1269 = vmatpush3.bf16.xpose.msk.msra.mxu0 %vm1525_vm1, %v1264_v21 }
  0x2e   :  { %1272 = vmatprep.subr.msk.bf16.mxu0 %vm1525_vm1, %v1270_v24 }
  0x35   :  { %1275 = vmatpush3.bf16.xpose.msk.msra.mxu0 %vm1525_vm1, %v1270_v24 }
  0x3c   :  { %1148 = vmatmul.mubr.msk.f32.vlgmr.msra.gmra.mrb[0].mxu0 %vm40_vm0, %v25_v25 }
  0x76   :  { %v173_v26 = vpop.permute.xlu0 %172 }
  0x7a   :  { %v175_v31 = vpop.permute.xlu0 %174 }
 0x10f   :  { %v1149_v27 = vpop.f32.mrb[0].mxu0 }
 0x110   :  { %v155_v28 = vpop.f32.mrb[1].mxu0  ;;  %v179_v32 = vmul.f32 %v1149_v27, %v175_v31  ;;  %v167_v38 = vmul.f32 %v1149_v27, %v165_v36 }
 0x111   :  { %v178_v29 = vmul.f32 %v173_v26, %v155_v28  ;;  %v1606_v30 = vpack.i.bf16 %v1149_v27, %v155_v28  ;;  %v166_v34 = vmul.f32 %v164_v33, %v155_v28 }
 0x113   :  { %182 = vrot.lane.b32.xlu1 %v178_v29, %s1470_s13 }
 0x117   :  { %184 = vrot.lane.b32.xlu1 %v179_v32, %s1470_s13  ;;  %s1473_s13 = smov 112  }
 0x185   :  { %v183_v35 = vpop.permute.xlu1 %182 }
 0x186   :  { %v188_v37 = vadd.f32 %v183_v35, %v166_v34 }
 0x188   :  { %192 = vrot.lane.b32.xlu0 %v188_v37, %s1471_s11  ;;  %1158 = vmatprep.mubr.msk.f32.mxu1 %vm226_vm2, %v188_v37 }
 0x189   :  { %v185_v39 = vpop.permute.xlu1 %184 }
 0x18a   :  { %v189_v40 = vadd.f32 %v185_v39, %v167_v38 }
 0x18c   :  { %194 = vrot.lane.b32.xlu1 %v189_v40, %s1471_s11  ;;  %v1359_v41 = vpack.i.bf16 %v189_v40, %v188_v37 }
 0x18e   :  { %1360 = vrot.lane.b32.xlu0 %v1359_v41, %s1472_s12 }
 0x192   :  { %196 = vrot.lane.b32.xlu0 %v188_v37, %s1473_s13 }
 0x196   :  { %200 = vrot.lane.b32.xlu0 %v188_v37, %s1474_s14 }
 0x1fa   :  { %v193_v42 = vpop.permute.xlu0 %192 }
 0x1fe   :  { %v195_v43 = vpop.permute.xlu1 %194 }
 0x1ff   :  { %v1364_v44 = vpack.i.bf16 %v195_v43, %v193_v42 }
 0x200   :  { %v1361_v45 = vpop.permute.xlu0 %1360 }
 0x201   :  { %v1363_v46 = vunpack.i.h.bf16 %v1361_v45  ;;  %v1362_v47 = vunpack.i.l.bf16 %v1361_v45  ;;  %1365 = vrot.lane.b32.xlu1 %v1364_v44, %s1472_s12 }
 0x203   :  { %v1276_v49 = vpack.c.bf16 %v1363_v46, %v1362_v47 }
 0x204   :  { %v197_v54 = vpop.permute.xlu0 %196 }
 0x205   :  { %198 = vrot.lane.b32.xlu1 %v189_v40, %s1473_s13  ;;  %1278 = vmatprep.subr.msk.bf16.mxu1 %vm1623_vm3, %v1276_v49 }
 0x206   :  { %1281 = vmatpush3.bf16.xpose.msk.msra.mxu1 %vm1623_vm3, %v1276_v49 }
 0x208   :  { %v201_v56 = vpop.permute.xlu0 %200 }
 0x209   :  { %202 = vrot.lane.b32.xlu1 %v189_v40, %s1474_s14 }
 0x273   :  { %v1366_v50 = vpop.permute.xlu1 %1365 }
 0x274   :  { %v1368_v51 = vunpack.i.h.bf16 %v1366_v50  ;;  %v1367_v52 = vunpack.i.l.bf16 %v1366_v50 }
 0x276   :  { %v1282_v53 = vpack.c.bf16 %v1368_v51, %v1367_v52 }
 0x277   :  { %v199_v55 = vpop.permute.xlu1 %198 }
 0x278   :  { %1284 = vmatprep.subr.msk.bf16.mxu1 %vm1623_vm3, %v1282_v53 }
 0x279   :  { %1287 = vmatpush3.bf16.xpose.msk.msra.mxu1 %vm1623_vm3, %v1282_v53 }
 0x27b   :  { %v203_v57 = vpop.permute.xlu1 %202 }
 0x280   :  { %1159 = vmatmul.mubr.msk.f32.vlgmr.msra.gmra.mrb[0].mxu1 %vm226_vm2, %v189_v40 }
 0x281   :  { %1161 = vmatprep.mubr.msk.f32.mxu1 %vm226_vm2, %v193_v42 }
 0x284   :  { %1162 = vmatmul.mubr.msk.f32.gmra.mrb[2].mxu1 %vm226_vm2, %v195_v43 }
 0x285   :  { %1164 = vmatprep.mubr.msk.f32.mxu1 %vm226_vm2, %v197_v54 }
 0x288   :  { %1165 = vmatmul.mubr.msk.f32.gmra.mrb[4].mxu1 %vm226_vm2, %v199_v55 }
 0x289   :  { %1167 = vmatprep.mubr.msk.f32.mxu1 %vm226_vm2, %v201_v56 }
 0x28c   :  { %1168 = vmatmul.mubr.msk.f32.gmra.mrb[6].mxu1 %vm226_vm2, %v203_v57 }
 0x353   :  { %v1160_v60 = vpop.f32.mrb[0].mxu1 }
 0x354   :  { %v323_v61 = vadd.f32 %v1160_v60, %v211_v58  ;;  %v317_v62 = vpop.f32.mrb[1].mxu1 }
 0x355   :  { %v318_v63 = vadd.f32 %v317_v62, %v210_v59 }
 0x356   :  { %v359_v0 = vsel %vm40_vm0, %v323_v61, -inf }
 0x357   :  { %360 = vmax.xlane.f32.xlu1 %v359_v0  ;;  %v1163_v2 = vpop.f32.mrb[2].mxu1  ;;  %v356_v3 = vsel %vm40_vm0, %v318_v63, -inf }
 0x358   :  { %v327_v5 = vpop.f32.mrb[3].mxu1  ;;  %357 = vmax.xlane.f32.xlu0 %v356_v3  ;;  %v333_v8 = vadd.f32 %v1163_v2, %v213_v4  ;;  %v1712_v4 = vld [vmem:[%s1813_s2] sm:$0xff] }
 0x359   :  { %v328_v6 = vadd.f32 %v327_v5, %v212_v1  ;;  %v1717_v5 = vld [vmem:[%s1813_s2 + $0x8] sm:$0xff] }
 0x35a   :  { %v365_v18 = vsel %vm40_vm0, %v333_v8, -inf }
 0x35b   :  { %v1166_v9 = vpop.f32.mrb[4].mxu1  ;;  %v362_v10 = vsel %vm40_vm0, %v328_v6, -inf }
 0x35c   :  { %v337_v12 = vpop.f32.mrb[5].mxu1  ;;  %363 = vmax.xlane.f32.xlu0 %v362_v10  ;;  %v1668_v15 = vadd.f32 %v1166_v9, %v215_v11 }
 0x35d   :  { %v338_v13 = vadd.f32 %v337_v12, %v214_v7  ;;  %v1384_v7 = vpack.i.bf16 %v1717_v5, %v1712_v4 }
 0x35e   :  { %v371_v24 = vsel %vm40_vm0, %v1668_v15, -inf }
 0x35f   :  { %v1169_v16 = vpop.f32.mrb[6].mxu1  ;;  %v368_v17 = vsel %vm40_vm0, %v338_v13, -inf }
 0x360   :  { %v347_v20 = vpop.f32.mrb[7].mxu1  ;;  %369 = vmax.xlane.f32.xlu1 %v368_v17  ;;  %366 = vmax.xlane.f32.xlu0 %v365_v18  ;;  %v353_v22 = vadd.f32 %v1169_v16, %v217_v19 }
 0x361   :  { %v348_v21 = vadd.f32 %v347_v20, %v216_v14 }
 0x362   :  { %v377_v25 = vsel %vm40_vm0, %v353_v22, -inf }
 0x363   :  { %v374_v23 = vsel %vm40_vm0, %v348_v21, -inf }
 0x364   :  { %375 = vmax.xlane.f32.xlu1 %v374_v23  ;;  %372 = vmax.xlane.f32.xlu0 %v371_v24 }
 0x368   :  { %378 = vmax.xlane.f32.xlu1 %v377_v25 }
 0x37a   :  { %1370 = vrot.lane.b32.xlu0 %v1606_v30, %s1471_s11 }
 0x3e4   :  { %v361_v26 = vpop.xlane.xlu1 %360 }
 0x3e5   :  { %v381_v27 = vsub.f32 %v323_v61, %v361_v26  ;;  %v358_v28 = vpop.xlane.xlu0 %357 }
 0x3e6   :  { %v380_v29 = vsub.f32 %v318_v63, %v358_v28 }
 0x3e7   :  { %v390_v31 = vmul.f32 1.442695, %v381_v27 }
 0x3e8   :  { %v388_v32 = vmul.f32 1.442695, %v380_v29 }
 0x3e9   :  { %1414 = vpow2.f32 %v390_v31  ;;  %v364_v33 = vpop.xlane.xlu0 %363 }
 0x3ea   :  { %1416 = vpow2.f32 %v388_v32  ;;  %v382_v34 = vsub.f32 %v328_v6, %v364_v33  ;;  %v1722_v6 = vld [vmem:[%s1813_s2 + $0x10] sm:$0xff] }
 0x3ec   :  { %v392_v38 = vmul.f32 1.442695, %v382_v34 }
 0x3ed   :  { %v367_v35 = vpop.xlane.xlu0 %366  ;;  %v370_v45 = vpop.xlane.xlu1 %369 }
 0x3ee   :  { %v383_v36 = vsub.f32 %v333_v8, %v367_v35  ;;  %v384_v52 = vsub.f32 %v338_v13, %v370_v45  ;;  %v1729_v8 = vld [vmem:[%s1813_s2 + $0x18] sm:$0xff]  ;;  %s1476_s2 = smov [#allocation2]  }
 0x3ef   :  { %v1389_v9 = vpack.i.bf16 %v1729_v8, %v1722_v6 }
 0x3f0   :  { %v394_v37 = vmul.f32 1.442695, %v383_v36  ;;  %v396_v53 = vmul.f32 1.442695, %v384_v52  ;;  %v1308_v52 = vpack.c.bf16 %v1717_v5, %v1712_v4 }
 0x3f1   :  { %v373_v39 = vpop.xlane.xlu0 %372  ;;  %v376_v50 = vpop.xlane.xlu1 %375 }
 0x3f2   :  { %1418 = vpow2.f32 %v394_v37  ;;  %v386_v54 = vsub.f32 %v348_v21, %v376_v50  ;;  %v385_v1 = vsub.f32 %v1668_v15, %v373_v39 }
 0x3f3   :  { %v1681_v40 = vpop.eup %1414  ;;  %1420 = vpow2.f32 %v392_v38 }
 0x3f4   :  { %v407_v41 = vsel %vm40_vm0, %v1681_v40, 0.0  ;;  %v1417_v42 = vpop.eup %1416  ;;  %1422 = vpow2.f32 %v396_v53  ;;  %v400_v56 = vmul.f32 1.442695, %v386_v54  ;;  %v398_v2 = vmul.f32 1.442695, %v385_v1 }
 0x3f5   :  { %408 = vadd.xlane.f32.xlu1 %v407_v41  ;;  %v1371_v43 = vpop.permute.xlu0 %1370  ;;  %v404_v44 = vsel %vm40_vm0, %v1417_v42, 0.0  ;;  %v379_v55 = vpop.xlane.xlu1 %378 }
 0x3f6   :  { %1380 = vrot.lane.b32.xlu0 %v1371_v43, %s1475_s5  ;;  %v387_v57 = vsub.f32 %v353_v22, %v379_v55  ;;  %1424 = vpow2.f32 %v400_v56 }
 0x3f8   :  { %v402_v58 = vmul.f32 1.442695, %v387_v57  ;;  %v1314_v57 = vpack.c.bf16 %v1729_v8, %v1722_v6 }
 0x3f9   :  { %405 = vadd.xlane.f32.xlu1 %v404_v44 }
 0x3fa   :  { %1426 = vpow2.f32 %v402_v58 }
 0x3fb   :  { %1428 = vpow2.f32 %v398_v2 }
 0x3fc   :  { %v1686_v46 = vpop.eup %1418 }
 0x3fd   :  { %v413_v47 = vsel %vm40_vm0, %v1686_v46, 0.0  ;;  %v1690_v49 = vpop.eup %1420 }
 0x3fe   :  { %414 = vadd.xlane.f32.xlu1 %v413_v47  ;;  %v410_v51 = vsel %vm40_vm0, %v1690_v49, 0.0  ;;  %v1423_v59 = vpop.eup %1422 }
 0x3ff   :  { %v416_v60 = vsel %vm40_vm0, %v1423_v59, 0.0 }
 0x400   :  { %v1696_v61 = vpop.eup %1424 }
 0x401   :  { %v422_v62 = vsel %vm40_vm0, %v1696_v61, 0.0 }
 0x402   :  { %411 = vadd.xlane.f32.xlu1 %v410_v51 }
 0x404   :  { %v1700_v63 = vpop.eup %1426 }
 0x405   :  { %v425_v0 = vsel %vm40_vm0, %v1700_v63, 0.0 }
 0x413   :  { %1375 = vrot.lane.b32.xlu1 %v1606_v30, %s1475_s5  ;;  %v1705_v30 = vpop.eup %1428 }
 0x414   :  { %v419_v3 = vsel %vm40_vm0, %v1705_v30, 0.0 }
 0x415   :  { %417 = vadd.xlane.f32.xlu0 %v416_v60 }
 0x419   :  { %423 = vadd.xlane.f32.xlu0 %v422_v62 }
 0x41d   :  { %426 = vadd.xlane.f32.xlu0 %v425_v0 }
 0x433   :  { %1385 = vrot.lane.b32.xlu0 %v1384_v7, %s1471_s11 }
 0x437   :  { %420 = vadd.xlane.f32.xlu1 %v419_v3  ;;  %1395 = vrot.lane.b32.xlu0 %v1384_v7, %s1473_s13 }
 0x43b   :  { %1400 = vrot.lane.b32.xlu0 %v1389_v9, %s1473_s13 }
 0x43f   :  { %1410 = vrot.lane.b32.xlu0 %v1389_v9, %s1474_s14 }
 0x448   :  { %1390 = vrot.lane.b32.xlu1 %v1389_v9, %s1471_s11  ;;  %s984_s11 = sshll.u32 %s1476_s2, 4  ;;  %s985_s11 = int_to_ptr.vmem [resolvable:$true] %s984_s11 }
 0x449   :  { %s1446_s12 = scalar_lea.vmem %s985_s11, 256  ;;  %p1451_p1 = scmp.lt.s32.totalorder %s985_s11, %s985_s11 }
 0x44a   :  { %p1447_p0 = scmp.ne.s32.totalorder %s985_s11, %s1446_s12  ;;  %p1452_p2 = scmp.lt.s32.totalorder %s1446_s12, %s1446_s12 }
 0x44c   :  { %1405 = vrot.lane.b32.xlu1 %v1384_v7, %s1474_s14  ;;  %p1453_p3 = por %p1452_p2, %p1451_p1 }
 0x44e   :  { %p1454_p4 = pnand %p1453_p3, %p1447_p0 }
 0x468   :  { %v1381_v15 = vpop.permute.xlu0 %1380 }
 0x469   :  { %v1383_v18 = vunpack.i.h.bf16 %v1381_v15  ;;  %v1382_v19 = vunpack.i.l.bf16 %v1381_v15 }
 0x46b   :  { %v1292_v23 = vpack.c.bf16 %v1383_v18, %v1382_v19 }
 0x482   :  { %v409_v10 = vpop.xlane.xlu1 %408 }
 0x486   :  { %v406_v11 = vpop.xlane.xlu1 %405 }
 0x487   :  { %1430 = vrcp.f32 %v406_v11 }
 0x488   :  { %1432 = vrcp.f32 %v409_v10 }
 0x48b   :  { %v415_v12 = vpop.xlane.xlu1 %414 }
 0x48f   :  { %v412_v13 = vpop.xlane.xlu1 %411 }
 0x490   :  { %1434 = vrcp.f32 %v412_v13 }
 0x491   :  { %v1431_v14 = vpop.eup %1430  ;;  %1436 = vrcp.f32 %v415_v12 }
 0x492   :  { %v436_v16 = vmul.f32 %v1431_v14, %v1417_v42  ;;  %v1433_v24 = vpop.eup %1432 }
 0x493   :  { %v1376_v17 = vpop.permute.xlu1 %1375  ;;  %v437_v26 = vmul.f32 %v1433_v24, %v1681_v40 }
 0x494   :  { %1178 = vmatprep.mubr.msk.f32.mxu0 %vm40_vm0, %v436_v16  ;;  %v1378_v20 = vunpack.i.h.bf16 %v1376_v17  ;;  %v1377_v21 = vunpack.i.l.bf16 %v1376_v17 }
 0x496   :  { %v1288_v22 = vpack.c.bf16 %v1378_v20, %v1377_v21 }
 0x498   :  { %1289 = vmatprep.subr.bf16.mxu0 %v1288_v22 }
 0x499   :  { %1291 = vmatpush3.bf16.msra.mxu0 %v1288_v22 }
 0x49a   :  { %1293 = vmatprep.subr.bf16.mxu0 %v1292_v23  ;;  %v1435_v25 = vpop.eup %1434 }
 0x49b   :  { %v1437_v27 = vpop.eup %1436  ;;  %v438_v28 = vmul.f32 %v1435_v25, %v1690_v49 }
 0x49c   :  { %v439_v29 = vmul.f32 %v1437_v27, %v1686_v46 }
 0x49d   :  { %1295 = vmatpush3.bf16.msra.mxu0 %v1292_v23 }
 0x4a0   :  { %1179 = vmatmul.mubr.msk.f32.vlgmr.msra.gmra.mrb[2].mxu0 %vm40_vm0, %v437_v26 }
 0x4a1   :  { %1181 = vmatprep.mubr.msk.f32.mxu0 %vm40_vm0, %v438_v28 }
 0x4a2   :  { %v418_v31 = vpop.xlane.xlu0 %417 }
 0x4a3   :  { %1438 = vrcp.f32 %v418_v31 }
 0x4a4   :  { %1182 = vmatmul.mubr.msk.f32.gmra.mrb[4].mxu0 %vm40_vm0, %v439_v29 }
 0x4a6   :  { %v424_v34 = vpop.xlane.xlu0 %423 }
 0x4a7   :  { %1440 = vrcp.f32 %v424_v34 }
 0x4aa   :  { %v427_v35 = vpop.xlane.xlu0 %426 }
 0x4ad   :  { %v1439_v32 = vpop.eup %1438 }
 0x4ae   :  { %v440_v33 = vmul.f32 %v1439_v32, %v1423_v59  ;;  %v1386_v37 = vpop.permute.xlu0 %1385 }
 0x4af   :  { %v1388_v38 = vunpack.i.h.bf16 %v1386_v37  ;;  %v1387_v39 = vunpack.i.l.bf16 %v1386_v37 }
 0x4b0   :  { %1184 = vmatprep.mubr.msk.f32.mxu0 %vm40_vm0, %v440_v33 }
 0x4b1   :  { %v1441_v43 = vpop.eup %1440  ;;  %v1296_v44 = vpack.c.bf16 %v1388_v38, %v1387_v39 }
 0x4b2   :  { %v442_v50 = vmul.f32 %v1441_v43, %v1696_v61  ;;  %v1396_v58 = vpop.permute.xlu0 %1395 }
 0x4b3   :  { %1298 = vmatprep.subr.msk.bf16.mxu1 %vm1623_vm3, %v1296_v44  ;;  %v1398_v59 = vunpack.i.h.bf16 %v1396_v58  ;;  %v1397_v60 = vunpack.i.l.bf16 %v1396_v58 }
 0x4b4   :  { %1301 = vmatpush3.bf16.xpose.msk.msra.mxu1 %vm1623_vm3, %v1296_v44 }
 0x4b5   :  { %v1320_v61 = vpack.c.bf16 %v1398_v59, %v1397_v60 }
 0x4b6   :  { %v1401_v62 = vpop.permute.xlu0 %1400 }
 0x4b7   :  { %v1402_v0 = vunpack.i.l.bf16 %v1401_v62 }
 0x4ba   :  { %v1411_v5 = vpop.permute.xlu0 %1410 }
 0x4bb   :  { %v1413_v6 = vunpack.i.h.bf16 %v1411_v5  ;;  %v1412_v7 = vunpack.i.l.bf16 %v1411_v5 }
 0x4bd   :  { %v1338_v10 = vpack.c.bf16 %v1413_v6, %v1412_v7 }
 0x4c4   :  { %v421_v36 = vpop.xlane.xlu1 %420 }
 0x4c5   :  { %1442 = vrcp.f32 %v421_v36 }
 0x4c6   :  { %1444 = vrcp.f32 %v427_v35 }
 0x4c8   :  { %v1391_v40 = vpop.permute.xlu1 %1390 }
 0x4c9   :  { %v1393_v41 = vunpack.i.h.bf16 %v1391_v40  ;;  %v1392_v42 = vunpack.i.l.bf16 %v1391_v40 }
 0x4cb   :  { %v1302_v46 = vpack.c.bf16 %v1393_v41, %v1392_v42 }
 0x4cc   :  { %v1406_v2 = vpop.permute.xlu1 %1405 }
 0x4cd   :  { %1304 = vmatprep.subr.msk.bf16.mxu1 %vm1623_vm3, %v1302_v46  ;;  %v1407_v3 = vunpack.i.l.bf16 %v1406_v2 }
 0x4ce   :  { %1307 = vmatpush3.bf16.xpose.msk.msra.mxu1 %vm1623_vm3, %v1302_v46 }
 0x4cf   :  { %v1443_v45 = vpop.eup %1442  ;;  %1310 = vmatprep.subr.msk.bf16.mxu1 %vm1623_vm3, %v1308_v52 }
 0x4d0   :  { %v441_v47 = vmul.f32 %v1443_v45, %v1705_v30  ;;  %v1445_v49 = vpop.eup %1444  ;;  %v1408_v30 = vunpack.i.h.bf16 %v1406_v2 }
 0x4d1   :  { %v443_v51 = vmul.f32 %v1445_v49, %v1700_v63  ;;  %v1403_v63 = vunpack.i.h.bf16 %v1401_v62 }
 0x4d2   :  { %1185 = vmatmul.mubr.msk.f32.gmra.mrb[6].mxu0 %vm40_vm0, %v441_v47  ;;  %v1332_v4 = vpack.c.bf16 %v1408_v30, %v1407_v3 }
 0x4d3   :  { %1187 = vmatprep.mubr.msk.f32.mxu0 %vm40_vm0, %v442_v50  ;;  %v1326_v1 = vpack.c.bf16 %v1403_v63, %v1402_v0 }
 0x4d6   :  { %1188 = vmatmul.mubr.msk.f32.gmra.mrb[8].mxu0 %vm40_vm0, %v443_v51 }
 0x573   :  { %v1180_v53 = vpop.f32.mrb[2].mxu0 }
 0x574   :  { %v546_v54 = vpop.f32.mrb[3].mxu0 }
 0x577   :  { %v1183_v55 = vpop.f32.mrb[4].mxu0 }
 0x578   :  { %v556_v56 = vpop.f32.mrb[5].mxu0 }
 0x579   :  { %1198 = vmatprep.mubr.msk.f32.mxu1 %vm226_vm2, %v556_v56 }
 0x57a   :  { %1199 = vmatmul.mubr.msk.f32.vlgmr.msra.gmra.mrb[8].mxu1 %vm226_vm2, %v1183_v55 }
 0x57b   :  { %1313 = vmatpush3.bf16.xpose.msk.msra.mxu1 %vm1623_vm3, %v1308_v52  ;;  %1209 = vmatprep.mubr.msk.f32.mxu1 %vm226_vm2, %v546_v54 }
 0x57c   :  { %1316 = vmatprep.subr.msk.bf16.mxu1 %vm1623_vm3, %v1314_v57 }
 0x583   :  { %1319 = vmatpush3.bf16.xpose.msk.msra.mxu1 %vm1623_vm3, %v1314_v57 }
 0x584   :  { %1322 = vmatprep.subr.msk.bf16.mxu1 %vm1623_vm3, %v1320_v61 }
 0x58a   :  { %1210 = vmatmul.mubr.msk.f32.vlgmr.msra.gmra.mrb[8].mxu1 %vm226_vm2, %v1180_v53 }
 0x58b   :  { %1325 = vmatpush3.bf16.xpose.msk.msra.mxu1 %vm1623_vm3, %v1320_v61 }
 0x58c   :  { %1328 = vmatprep.subr.msk.bf16.mxu1 %vm1623_vm3, %v1326_v1 }
 0x593   :  { %1331 = vmatpush3.bf16.xpose.msk.msra.mxu1 %vm1623_vm3, %v1326_v1 }
 0x594   :  { %1334 = vmatprep.subr.msk.bf16.mxu1 %vm1623_vm3, %v1332_v4 }
 0x5a5   :  { %v1186_v8 = vpop.f32.mrb[6].mxu0 }
 0x5a6   :  { %v566_v9 = vpop.f32.mrb[7].mxu0 }
 0x5a7   :  { %1220 = vmatprep.mubr.msk.f32.mxu1 %vm226_vm2, %v566_v9 }
 0x5a8   :  { %1221 = vmatmul.mubr.msk.f32.vlgmr.msra.gmra.mrb[8].mxu1 %vm226_vm2, %v1186_v8 }
 0x5a9   :  { %1337 = vmatpush3.bf16.xpose.msk.msra.mxu1 %vm1623_vm3, %v1332_v4  ;;  %v1189_v11 = vpop.f32.mrb[8].mxu0 }
 0x5aa   :  { %v576_v12 = vpop.f32.mrb[9].mxu0  ;;  %1340 = vmatprep.subr.msk.bf16.mxu1 %vm1623_vm3, %v1338_v10 }
 0x5ab   :  { %1231 = vmatprep.mubr.msk.f32.mxu1 %vm226_vm2, %v576_v12 }
 0x5b1   :  { %1343 = vmatpush3.bf16.xpose.msk.msra.mxu1 %vm1623_vm3, %v1338_v10 }
 0x5b8   :  { %1232 = vmatmul.mubr.msk.f32.vlgmr.msra.gmra.mrb[8].mxu1 %vm226_vm2, %v1189_v11 }
 0x68b   :  { %v1233_v13 = vpop.f32.mrb[8].mxu1 }
 0x68c   :  { %978 = vst.msk [vmem:[#allocation2 + $0x8] sm:$0xff] %vm40_vm0, %v1233_v13  ;;  %v966_v14 = vpop.f32.mrb[9].mxu1 }
 0x68d   :  { %977 = vst.msk [vmem:[#allocation2] sm:$0xff] %vm40_vm0, %v966_v14 }
 0x68e   :  { %1457 = shalt.err (!%p1454_p4)
}
 0x68f   :  { %s1458_s3 = scalar_lea.hbm %s1817_s6, 256 }
 0x690   :  { %p1459_p5 = scmp.ne.s32.totalorder %s1817_s6, %s1458_s3  ;;  %p1462_p6 = scmp.lt.u32.totalorder %s1458_s3, %s1817_s6 }
 0x692   :  { %p1464_p7 = pnand %p1462_p6, %p1459_p5 }
 0x694   :  { %1467 = shalt.err (!%p1464_p7)
}
 0x695   :  { %s1477_s19 = smov 128   ;;  %s1478_s4 = smov 8  }
 0x696   :  { %990 = dma.vmem_to_hbm [thread:$0]  %s985_s11, 256, %s1817_s6, [#allocation3], %s1477_s19, %s1477_s19, %s1478_s4  }
 0x697   :  { %1468 = dma.done.wait [#allocation3], 256  }
 0x698   :  { %1469 = vsyncadd [#allocation3], 4294967040 }
 0x699   :  { %994 = vsyncpa [#allocation3], 1 }

</bundles_post_ra>
